<compile_context>
chip_gen: v6e
topology: v6e:2x2x1
jax: 0.10.0
libtpu: 0.0.40
codegen_flags: <defaults>
</compile_context>

<pallas_src>
import jax
import jax.numpy as jnp
from jax.experimental import pallas as pl
from jax.experimental.pallas import tpu as pltpu


def time_embedding_kernel(x_ref, w1_ref, b1_ref, w2_ref, b2_ref, out_ref, h_ref):
    # Compute SiLU(linear_1(x)) once; reuse it for every output-column tile of linear_2.
    @pl.when(pl.program_id(0) == 0)
    def _():
        x = x_ref[...].astype(jnp.bfloat16)
        # x: (B, n_embd) contracted with w1: (4n, n_embd) over the 'in' axis -> (B, 4n)
        h = jax.lax.dot_general(
            x, w1_ref[...],
            dimension_numbers=(((1,), (1,)), ((), ())),
            preferred_element_type=jnp.float32,
        ) + b1_ref[...]
        h = h * jax.nn.sigmoid(h)            # SiLU in f32 (sigmoid -> EUP)
        h_ref[...] = h.astype(jnp.bfloat16)

    # linear_2 tile: h (B, 4n) contracted with w2 tile (TN, 4n) over 'in' -> (B, TN)
    out = jax.lax.dot_general(
        h_ref[...], w2_ref[...],
        dimension_numbers=(((1,), (1,)), ((), ())),
        preferred_element_type=jnp.float32,
    ) + b2_ref[...]
    out_ref[...] = out.astype(out_ref.dtype)


def prepare_time_embedding_params(w1, b1, w2, b2):
    """One-time parameter prep (call at init, NOT per forward):
    weights kept in PyTorch (out, in) layout but cast to bf16; biases as f32 (1, out)."""
    return (
        w1.astype(jnp.bfloat16),
        b1.reshape(1, -1).astype(jnp.float32),
        w2.astype(jnp.bfloat16),
        b2.reshape(1, -1).astype(jnp.float32),
    )


def _pick_block_n(hidden):
    # Largest multiple of 128 that divides `hidden`, capped at 512 (lane-dense tiles).
    for tn in (512, 384, 256, 128):
        if hidden % tn == 0:
            return tn
    raise ValueError("hidden (= 4*n_embd) must be a multiple of 128")


def time_embedding(x, w1_bf16, b1_row, w2_bf16, b2_row):
    """x: (B, n_embd) f32; params from prepare_time_embedding_params. Returns (B, 4n)."""
    B, n_embd = x.shape
    hidden = w1_bf16.shape[0]                    # 4 * n_embd
    block_n = _pick_block_n(hidden)

    # Pad batch up to a full sublane so stores are unmasked (zero rows are sliced off).
    b_pad = max(8, ((B + 7) // 8) * 8)
    if b_pad != B:
        x = jnp.pad(x, ((0, b_pad - B), (0, 0)))

    grid = (hidden // block_n,)

    out = pl.pallas_call(
        time_embedding_kernel,
        out_shape=jax.ShapeDtypeStruct((b_pad, hidden), x.dtype),
        grid_spec=pltpu.PrefetchScalarGridSpec(
            num_scalar_prefetch=0,
            grid=grid,
            in_specs=[
                pl.BlockSpec((b_pad, n_embd), lambda j: (0, 0)),     # x (resident)
                pl.BlockSpec((hidden, n_embd), lambda j: (0, 0)),    # w1 (resident)
                pl.BlockSpec((1, hidden), lambda j: (0, 0)),         # b1 (resident)
                pl.BlockSpec((block_n, hidden), lambda j: (j, 0)),   # w2 tile (streams)
                pl.BlockSpec((1, block_n), lambda j: (0, j)),        # b2 tile
            ],
            out_specs=pl.BlockSpec((b_pad, block_n), lambda j: (0, j)),
            scratch_shapes=[pltpu.VMEM((b_pad, hidden), jnp.bfloat16)],  # h carry
        ),
        compiler_params=pltpu.CompilerParams(
            dimension_semantics=("arbitrary",),   # scratch carried across N tiles
        ),
    )(x, w1_bf16, b1_row, w2_bf16, b2_row)

    return out[:B]


def time_embedding_ref_f32(x, w1, b1, w2, b2):
    h = x @ w1.T + b1
    h = h * jax.nn.sigmoid(h)
    return h @ w2.T + b2


def time_embedding_ref_mixed(x, w1, b1, w2, b2):
    # Mirrors the kernel's mixed precision: bf16 matmul inputs, f32 accumulate/SiLU.
    f32 = jnp.float32
    xb = x.astype(jnp.bfloat16).astype(f32)
    w1b = w1.astype(jnp.bfloat16).astype(f32)
    w2b = w2.astype(jnp.bfloat16).astype(f32)
    h = xb @ w1b.T + b1
    h = h * jax.nn.sigmoid(h)
    hb = h.astype(jnp.bfloat16).astype(f32)
    return hb @ w2b.T + b2


if __name__ == "__main__":
    # Small shapes consistent with the module: batch=2, n_embd=32 -> hidden=128.
    B, n_embd = 2, 32
    hidden = 4 * n_embd

    key = jax.random.PRNGKey(0)
    k_x, k_w1, k_b1, k_w2, k_b2 = jax.random.split(key, 5)

    x = jax.random.normal(k_x, (B, n_embd), dtype=jnp.float32)
    # Synthetic params (shapes follow nn.Linear: weight = (out, in)).
    w1 = jax.random.normal(k_w1, (hidden, n_embd), dtype=jnp.float32) * 0.05
    b1 = jax.random.normal(k_b1, (hidden,), dtype=jnp.float32) * 0.05
    w2 = jax.random.normal(k_w2, (hidden, hidden), dtype=jnp.float32) * 0.05
    b2 = jax.random.normal(k_b2, (hidden,), dtype=jnp.float32) * 0.05

    # One-time parameter preparation (bf16 weights, 2-D biases).
    params = prepare_time_embedding_params(w1, b1, w2, b2)

    out = time_embedding(x, *params)
    out = jax.block_until_ready(out)
    assert out.shape == (B, hidden)

    # Tight check vs. a mixed-precision reference (same bf16 rounding as the kernel).
    ref_mixed = time_embedding_ref_mixed(x, w1, b1, w2, b2)
    assert jnp.allclose(out, ref_mixed, atol=1e-2, rtol=1e-2), "mismatch vs mixed ref"

    # Looser check vs. the full-f32 PyTorch-equivalent reference.
    ref_f32 = time_embedding_ref_f32(x, w1, b1, w2, b2)
    assert jnp.allclose(out, ref_f32, atol=5e-2, rtol=5e-2), "mismatch vs f32 ref"

    print("KERNEL_OK")
</pallas_src>

<mosaic_0001>
module attributes {stable_mosaic.version = 11 : i64} {
  func.func @time_embedding_kernel(%arg0: i32, %arg1: memref<8x32xf32, #tpu.memory_space<vmem>>, %arg2: memref<128x32xbf16, #tpu.memory_space<vmem>>, %arg3: memref<1x128xf32, #tpu.memory_space<vmem>>, %arg4: memref<128x128xbf16, #tpu.memory_space<vmem>>, %arg5: memref<1x128xf32, #tpu.memory_space<vmem>>, %arg6: memref<8x128xf32, #tpu.memory_space<vmem>>, %arg7: memref<8x128xbf16, #tpu.memory_space<vmem>>) attributes {dimension_semantics = [#tpu.dimension_semantics<arbitrary>], iteration_bounds = array<i64: 1>, scalar_prefetch = 0 : i64, scratch_operands = 1 : i64, tpu.core_type = #tpu.core_type<tc>, window_params = [{pipeline_mode = #tpu.pipeline_mode<synchronous>, transform_indices = @transform_0, window_bounds = array<i64: 8, 32>}, {pipeline_mode = #tpu.pipeline_mode<synchronous>, transform_indices = @transform_1, window_bounds = array<i64: 128, 32>}, {pipeline_mode = #tpu.pipeline_mode<synchronous>, transform_indices = @transform_2, window_bounds = array<i64: 1, 128>}, {transform_indices = @transform_3, window_bounds = array<i64: 128, 128>}, {transform_indices = @transform_4, window_bounds = array<i64: 1, 128>}, {transform_indices = @transform_5, window_bounds = array<i64: 8, 128>}]} {
    %c0_i32 = arith.constant 0 : i32
    %0 = arith.cmpi eq, %arg0, %c0_i32 : i32
    %1 = arith.extui %0 : i1 to i32
    %c0_i32_0 = arith.constant 0 : i32
    %2 = arith.cmpi ne, %1, %c0_i32_0 : i32
    scf.if %2 {
      %c0_8 = arith.constant 0 : index
      %c0_9 = arith.constant 0 : index
      %10 = vector.load %arg1[%c0_8, %c0_9] : memref<8x32xf32, #tpu.memory_space<vmem>>, vector<8x32xf32>
      %11 = arith.truncf %10 : vector<8x32xf32> to vector<8x32xbf16>
      %c0_10 = arith.constant 0 : index
      %c0_11 = arith.constant 0 : index
      %12 = vector.load %arg2[%c0_10, %c0_11] : memref<128x32xbf16, #tpu.memory_space<vmem>>, vector<128x32xbf16>
      %cst_12 = arith.constant dense<0.000000e+00> : vector<8x128xf32>
      %13 = tpu.matmul %11, %12, %cst_12 {dimension_numbers = #tpu.dot_dimension_numbers<[1], [1], [0], [0], [0, 0, 1, 0], [], []>} : vector<8x32xbf16>, vector<128x32xbf16>, vector<8x128xf32> -> vector<8x128xf32>
      %c0_13 = arith.constant 0 : index
      %c0_14 = arith.constant 0 : index
      %14 = vector.load %arg3[%c0_13, %c0_14] : memref<1x128xf32, #tpu.memory_space<vmem>>, vector<1x128xf32>
      %15 = vector.broadcast %14 : vector<1x128xf32> to vector<8x128xf32>
      %16 = arith.addf %13, %15 : vector<8x128xf32>
      %17 = arith.negf %16 : vector<8x128xf32>
      %18 = math.exp %17 : vector<8x128xf32>
      %cst_15 = arith.constant 1.000000e+00 : f32
      %19 = vector.broadcast %cst_15 : f32 to vector<8x128xf32>
      %20 = arith.addf %19, %18 : vector<8x128xf32>
      %21 = arith.divf %19, %20 : vector<8x128xf32>
      %22 = arith.mulf %16, %21 : vector<8x128xf32>
      %23 = arith.truncf %22 : vector<8x128xf32> to vector<8x128xbf16>
      %c0_16 = arith.constant 0 : index
      %c0_17 = arith.constant 0 : index
      %24 = vector.load %arg7[%c0_16, %c0_17] : memref<8x128xbf16, #tpu.memory_space<vmem>>, vector<8x128xbf16>
      tpu.vector_store %arg7[%c0_16, %c0_17], %23 {strides = array<i32>} : memref<8x128xbf16, #tpu.memory_space<vmem>>, vector<8x128xbf16>,
    } else {
    }
    %c0 = arith.constant 0 : index
    %c0_1 = arith.constant 0 : index
    %3 = vector.load %arg7[%c0, %c0_1] : memref<8x128xbf16, #tpu.memory_space<vmem>>, vector<8x128xbf16>
    %c0_2 = arith.constant 0 : index
    %c0_3 = arith.constant 0 : index
    %4 = vector.load %arg4[%c0_2, %c0_3] : memref<128x128xbf16, #tpu.memory_space<vmem>>, vector<128x128xbf16>
    %cst = arith.constant dense<0.000000e+00> : vector<8x128xf32>
    %5 = tpu.matmul %3, %4, %cst {dimension_numbers = #tpu.dot_dimension_numbers<[1], [1], [0], [0], [0, 0, 1, 0], [], []>} : vector<8x128xbf16>, vector<128x128xbf16>, vector<8x128xf32> -> vector<8x128xf32>
    %c0_4 = arith.constant 0 : index
    %c0_5 = arith.constant 0 : index
    %6 = vector.load %arg5[%c0_4, %c0_5] : memref<1x128xf32, #tpu.memory_space<vmem>>, vector<1x128xf32>
    %7 = vector.broadcast %6 : vector<1x128xf32> to vector<8x128xf32>
    %8 = arith.addf %5, %7 : vector<8x128xf32>
    %c0_6 = arith.constant 0 : index
    %c0_7 = arith.constant 0 : index
    %9 = vector.load %arg6[%c0_6, %c0_7] : memref<8x128xf32, #tpu.memory_space<vmem>>, vector<8x128xf32>
    tpu.vector_store %arg6[%c0_6, %c0_7], %8 {strides = array<i32>} : memref<8x128xf32, #tpu.memory_space<vmem>>, vector<8x128xf32>,
    return
  }
  func.func @transform_0(%arg0: i32) -> (i32, i32) {
    %c0_i32 = arith.constant 0 : i32
    %c0_i32_0 = arith.constant 0 : i32
    %c0_i32_1 = arith.constant 0 : i32
    return %c0_i32, %c0_i32_0 : i32, i32
  }
  func.func @transform_1(%arg0: i32) -> (i32, i32) {
    %c0_i32 = arith.constant 0 : i32
    %c0_i32_0 = arith.constant 0 : i32
    %c0_i32_1 = arith.constant 0 : i32
    return %c0_i32, %c0_i32_0 : i32, i32
  }
  func.func @transform_2(%arg0: i32) -> (i32, i32) {
    %c0_i32 = arith.constant 0 : i32
    %c0_i32_0 = arith.constant 0 : i32
    %c0_i32_1 = arith.constant 0 : i32
    return %c0_i32, %c0_i32_0 : i32, i32
  }
  func.func @transform_3(%arg0: i32) -> (i32, i32) {
    %c0_i32 = arith.constant 0 : i32
    %c0_i32_0 = arith.constant 0 : i32
    return %arg0, %c0_i32 : i32, i32
  }
  func.func @transform_4(%arg0: i32) -> (i32, i32) {
    %c0_i32 = arith.constant 0 : i32
    %c0_i32_0 = arith.constant 0 : i32
    return %c0_i32, %arg0 : i32, i32
  }
  func.func @transform_5(%arg0: i32) -> (i32, i32) {
    %c0_i32 = arith.constant 0 : i32
    %c0_i32_0 = arith.constant 0 : i32
    return %c0_i32, %arg0 : i32, i32
  }
}

</mosaic_0001>

<bundles_post_ra>
// kernel: tpu_custom_call.1
= control target key start
LH: loop header
LB: loop body
LE: loop exit
PB: predicated region body
PF: predicated region fallthrough
CT: control target
= control target key end

     0   :  { %v418_v1 = vmov 0.0   ;;  %vm91_vm0 = vcmask 261120   ;;  %vm419_vm1 = vmmov 0   ;;  %s520_s0 = inlined_call_operand.vmem [shape: f32[8,32], index: 0, kind: input, shape index: {}]   ;;  %s521_s1 = inlined_call_operand.vmem [shape: bf16[128,32], index: 1, kind: input, shape index: {}]   ;;  %s522_s2 = inlined_call_operand.vmem [shape: f32[1,128], index: 2, kind: input, shape index: {}]   ;;  %s523_s3 = inlined_call_operand.vmem [shape: bf16[128,128], index: 3, kind: input, shape index: {}]   ;;  %s524_s4 = inlined_call_operand.vmem [shape: f32[1,128], index: 4, kind: input, shape index: {}]   ;;  %s525_s5 = inlined_call_operand.hbm [shape: f32[8,128], index: 5, kind: output, shape index: {}]  }
   0x1   :  { %v376_v0 = vld [vmem:[%s521_s1 + $0x38] sm:$0xff]   ;;  %333 = vmatprep.subr.bf16.mxu0 %v418_v1  ;;  %353 = vmatprep.subr.bf16.mxu1 %v418_v1  ;;  %v377_v3 = vld [vmem:[%s521_s1 + $0x30] sm:$0xff]   ;;  %v378_v6 = vld [vmem:[%s521_s1 + $0x28] sm:$0xff]  }
   0x2   :  { %v117_v2 = vsel %vm91_vm0, %v376_v0, 0  ;;  %v114_v4 = vsel %vm91_vm0, %v377_v3, 0  ;;  %v384_v5 = vld [vmem:[%s523_s3 + $0x38] sm:$0xff]   ;;  %349 = vmatprep.mubr.msk.bf16.mxu0 %vm419_vm1, %v418_v1  ;;  %369 = vmatprep.mubr.msk.bf16.mxu1 %vm419_vm1, %v418_v1  ;;  %v385_v7 = vld [vmem:[%s523_s3 + $0x30] sm:$0xff]  }
   0x3   :  { %334 = vmatpush3.bf16.xpose.msra.mxu0 %v117_v2  ;;  %354 = vmatpush3.bf16.xpose.msra.mxu1 %v384_v5 }
   0x4   :  { %335 = vmatprep.subr.bf16.mxu0 %v418_v1  ;;  %355 = vmatprep.subr.bf16.mxu1 %v418_v1 }
   0xb   :  { %336 = vmatpush3.bf16.xpose.msra.mxu0 %v114_v4 }
   0xc   :  { %337 = vmatprep.subr.bf16.mxu0 %v418_v1 }
   0xd   :  { %10 = vsyncpa [#allocation4], 0  ;;  %v111_v8 = vsel %vm91_vm0, %v378_v6, 0  ;;  %356 = vmatpush3.bf16.xpose.msra.mxu1 %v385_v7  ;;  %v379_v9 = vld [vmem:[%s521_s1 + $0x20] sm:$0xff]   ;;  %v380_v11 = vld [vmem:[%s521_s1 + $0x18] sm:$0xff]  }
   0xe   :  { %357 = vmatprep.subr.bf16.mxu1 %v418_v1  ;;  %v108_v10 = vsel %vm91_vm0, %v379_v9, 0  ;;  %v105_v12 = vsel %vm91_vm0, %v380_v11, 0  ;;  %v381_v13 = vld [vmem:[%s521_s1 + $0x10] sm:$0xff]   ;;  %v382_v15 = vld [vmem:[%s521_s1 + $0x8] sm:$0xff]   ;;  %v383_v17 = vld [vmem:[%s521_s1] sm:$0xff]  }
   0xf   :  { %v102_v14 = vsel %vm91_vm0, %v381_v13, 0  ;;  %v99_v16 = vsel %vm91_vm0, %v382_v15, 0  ;;  %v96_v18 = vsel %vm91_vm0, %v383_v17, 0  ;;  %v26_v19 = vld [vmem:[%s520_s0] sm:$0xff]  ;;  %v386_v21 = vld [vmem:[%s523_s3 + $0x28] sm:$0xff]   ;;  %v388_v23 = vld [vmem:[%s523_s3 + $0x18] sm:$0xff]  }
  0x10   :  { %v27_v20 = vpack.c.bf16 %v26_v19, %v26_v19  ;;  %v387_v22 = vld [vmem:[%s523_s3 + $0x20] sm:$0xff]   ;;  %v389_v24 = vld [vmem:[%s523_s3 + $0x10] sm:$0xff]   ;;  %v390_v25 = vld [vmem:[%s523_s3 + $0x8] sm:$0xff]  }
  0x11   :  { %v391_v26 = vld [vmem:[%s523_s3] sm:$0xff]  }
  0x12   :  { %v295_v27 = vld [vmem:[%s522_s2] ss:$0 sm:$0xff]  ;;  %s420_s2 = smov [#allocation3]  }
  0x13   :  { %338 = vmatpush3.bf16.xpose.msra.mxu0 %v111_v8  ;;  %v306_v40 = vld [vmem:[%s524_s4] ss:$0 sm:$0xff]  ;;  %s287_s28 = sshll.u32 %s420_s2, 4  ;;  %s288_s28 = int_to_ptr.vmem [resolvable:$true] %s287_s28 }
  0x14   :  { %339 = vmatprep.subr.bf16.mxu0 %v418_v1  ;;  %s396_s29 = scalar_lea.vmem %s288_s28, 128  ;;  %p401_p1 = scmp.lt.s32.totalorder %s288_s28, %s288_s28 }
  0x15   :  { %358 = vmatpush3.bf16.xpose.msra.mxu1 %v386_v21  ;;  %p397_p0 = scmp.ne.s32.totalorder %s288_s28, %s396_s29  ;;  %p402_p2 = scmp.lt.s32.totalorder %s396_s29, %s396_s29 }
  0x16   :  { %359 = vmatprep.subr.bf16.mxu1 %v418_v1 }
  0x17   :  { %p403_p3 = por %p402_p2, %p401_p1 }
  0x19   :  { %p404_p4 = pnand %p403_p3, %p397_p0 }
  0x1b   :  { %340 = vmatpush3.bf16.xpose.msra.mxu0 %v108_v10 }
  0x1c   :  { %341 = vmatprep.subr.bf16.mxu0 %v418_v1 }
  0x1d   :  { %360 = vmatpush3.bf16.xpose.msra.mxu1 %v387_v22 }
  0x1e   :  { %361 = vmatprep.subr.bf16.mxu1 %v418_v1 }
  0x23   :  { %342 = vmatpush3.bf16.xpose.msra.mxu0 %v105_v12 }
  0x24   :  { %343 = vmatprep.subr.bf16.mxu0 %v418_v1 }
  0x25   :  { %362 = vmatpush3.bf16.xpose.msra.mxu1 %v388_v23 }
  0x26   :  { %363 = vmatprep.subr.bf16.mxu1 %v418_v1 }
  0x2b   :  { %344 = vmatpush3.bf16.xpose.msra.mxu0 %v102_v14 }
  0x2c   :  { %345 = vmatprep.subr.bf16.mxu0 %v418_v1 }
  0x2d   :  { %364 = vmatpush3.bf16.xpose.msra.mxu1 %v389_v24 }
  0x2e   :  { %365 = vmatprep.subr.bf16.mxu1 %v418_v1 }
  0x33   :  { %346 = vmatpush3.bf16.xpose.msra.mxu0 %v99_v16 }
  0x34   :  { %347 = vmatprep.subr.bf16.mxu0 %v418_v1 }
  0x35   :  { %366 = vmatpush3.bf16.xpose.msra.mxu1 %v390_v25 }
  0x36   :  { %367 = vmatprep.subr.bf16.mxu1 %v418_v1 }
  0x3b   :  { %348 = vmatpush3.bf16.xpose.msra.mxu0 %v96_v18 }
  0x3d   :  { %368 = vmatpush3.bf16.xpose.msra.mxu1 %v391_v26 }
  0x42   :  { %350 = vmatmul.mubr.msk.bf16.vlgmr.msra.gmra.mxu0 %vm91_vm0, %v27_v20 }
 0x102   :  { %v153_v28 = vpop.f32.mrf.mxu0 }
 0x103   :  { %v154_v29 = vadd.f32 %v295_v27, %v153_v28 }
 0x104   :  { %v351_v30 = vpop.f32.mrf.mxu0 }
 0x105   :  { %v305_v31 = vmul.f32 -1.442695, %v154_v29 }
 0x106   :  { %v156_v32 = vpop.f32.mrf.mxu0 }
 0x107   :  { %392 = vpow2.f32 %v305_v31 }
 0x108   :  { %v352_v33 = vpop.f32.mrf.mxu0 }
 0x114   :  { %v393_v34 = vpop.eup %392 }
 0x115   :  { %v162_v35 = vadd.f32 1.0, %v393_v34 }
 0x117   :  { %394 = vrcp.f32 %v162_v35 }
 0x124   :  { %v395_v36 = vpop.eup %394 }
 0x125   :  { %v165_v37 = vmul.f32 %v395_v36, %v154_v29 }
 0x127   :  { %v166_v38 = vpack.c.bf16 %v165_v37, %v165_v37 }
 0x129   :  { %167 = vst [vmem:[#allocation2] sm:$0xf] %v166_v38 }
 0x130   :  { %v168_v39 = vld [vmem:[#allocation2] sm:$0xf] }
 0x131   :  { %370 = vmatmul.mubr.bf16.vlgmr.msra.gmra.mxu1 %v168_v39 }
 0x1f1   :  { %v274_v41 = vpop.f32.mrf.mxu1 }
 0x1f2   :  { %v275_v42 = vadd.f32 %v306_v40, %v274_v41 }
 0x1f3   :  { %v371_v43 = vpop.f32.mrf.mxu1 }
 0x1f4   :  { %280 = vst [vmem:[#allocation3] sm:$0xff] %v275_v42 }
 0x1f5   :  { %v277_v44 = vpop.f32.mrf.mxu1 }
 0x1f6   :  { %407 = shalt.err (!%p404_p4)
}
 0x1f7   :  { %290 = dma.vmem_to_hbm [thread:$0]  %s288_s28, 128, %s525_s5, [#allocation4]   ;;  %v372_v45 = vpop.f32.mrf.mxu1 }
 0x1f8   :  { %416 = dma.done.wait [#allocation4], 128  }
 0x1f9   :  { %417 = vsyncadd [#allocation4], 4294967168 }
 0x1fa   :  { %294 = vsyncpa [#allocation4], 1 }

</bundles_post_ra>
